<compile_context>
chip_gen: v7x
topology: tpu7x:2x2x1
jax: 0.10.0
libtpu: 0.0.40
codegen_flags: <defaults>
</compile_context>

<pallas_src>
import jax
import jax.numpy as jnp
from jax import lax
from jax.experimental import pallas as pl
from jax.experimental.pallas import tpu as pltpu


_MXU_MIN_CHANNELS = 64  # use the MXU for the channel reduction when C >= this


def _make_conv1x1_kernel(chunk, num_full, rem, use_mxu):
    """Build the kernel for a fixed tile layout: tile_hw = num_full*chunk + rem."""

    def kernel(b_ref, w_ref, x_ref, o_ref):
        # b_ref: (1,)          f32 SMEM
        # w_ref: (C, 1) VMEM f32 (VPU path)  or  (1, C) VMEM f32 (MXU path)
        # x_ref: (C, tile_hw)  native dtype VMEM
        # o_ref: (1, tile_hw)  output dtype VMEM (lane-dense)
        w = w_ref[...]          # resident across the lane-chunk loop
        b = b_ref[0]

        def emit(start, width):
            xs = x_ref[:, pl.ds(start, width)].astype(jnp.float32)   # (C, width)
            if use_mxu:
                acc = jnp.dot(w, xs, preferred_element_type=jnp.float32)  # (1, width)
            else:
                # dense multiply (all sublanes) + sublane reduce (XLU slot)
                acc = jnp.sum(xs * w, axis=0, keepdims=True)              # (1, width)
            o_ref[:, pl.ds(start, width)] = (acc + b).astype(o_ref.dtype)

        if num_full == 1 and rem == 0:
            emit(0, chunk)
        else:
            def body(i, carry):
                emit(pl.multiple_of(i * chunk, chunk), chunk)
                return carry
            lax.fori_loop(0, num_full, body, 0)
            if rem:
                emit(num_full * chunk, rem)   # static trailing remainder

    return kernel


def _vmem_capacity_bytes():
    try:
        return int(pltpu.get_tpu_info().vmem_capacity_bytes)
    except Exception:
        return 64 << 20    # conservative fallback = v7x per-TensorCore VMEM


def _choose_tile_hw(hw, c, elt_bytes, out_elt_bytes):
    """Lane-tile size: large enough to amortize per-grid-step overhead, small
    enough that the double-buffered input+output blocks fit in VMEM."""
    cap = _vmem_capacity_bytes()
    budget = cap // 2                                   # headroom for scratch
    bytes_per_lane = 2 * (c * elt_bytes + out_elt_bytes)  # double-buffered in+out
    max_lanes = budget // max(bytes_per_lane, 1)
    target_lanes = (8 << 20) // max(c * elt_bytes, 1)   # ~8 MiB input block
    lanes = min(max_lanes, target_lanes)
    lanes = max(128, (lanes // 128) * 128)
    return hw if hw <= lanes else lanes


def _lane_chunk(c, tile_hw):
    """In-kernel strip-mine width: keep the (C, chunk) f32 working set ~16 vregs."""
    chunk = max(128, min(4096, (16384 // max(c, 1)) // 128 * 128))
    return min(chunk, tile_hw)


def unet_head_forward(feature, weight, bias):
    """feature: (N, C, H, W). weight: (1, C, 1, 1). bias: (1,).

    Returns (N, 1, H, W) in feature.dtype, matching nn.Conv2d(in_channels, 1, 1).
    """
    N, C, H, W = feature.shape
    HW = H * W
    out_dtype = feature.dtype
    elt = jnp.dtype(feature.dtype).itemsize
    out_elt = jnp.dtype(out_dtype).itemsize

    x = feature.reshape(N, C, HW)                        # free view, native dtype
    use_mxu = C >= _MXU_MIN_CHANNELS
    w_shape = (1, C) if use_mxu else (C, 1)
    w = weight.reshape(w_shape).astype(jnp.float32)      # tiny, resident VMEM operand
    b = bias.reshape(1).astype(jnp.float32)              # SMEM scalar

    tile_hw = _choose_tile_hw(HW, C, elt, out_elt)
    chunk = _lane_chunk(C, tile_hw)
    num_full, rem = divmod(tile_hw, chunk)
    grid = (N, pl.cdiv(HW, tile_hw))

    # Double-buffered input + output blocks + weight + margin for compiler scratch.
    footprint = 2 * (C * tile_hw * elt + tile_hw * out_elt) + C * 4 + 4
    vmem_limit = int(footprint + (8 << 20))

    kernel = _make_conv1x1_kernel(chunk, num_full, rem, use_mxu)

    out = pl.pallas_call(
        kernel,
        out_shape=jax.ShapeDtypeStruct((N, 1, HW), out_dtype),
        grid=grid,
        in_specs=[
            pl.BlockSpec(memory_space=pltpu.MemorySpace.SMEM),           # bias
            pl.BlockSpec(w_shape, lambda n, j: (0, 0)),                  # weight (resident)
            pl.BlockSpec((None, C, tile_hw), lambda n, j: (n, 0, j)),    # x tile
        ],
        out_specs=pl.BlockSpec((None, 1, tile_hw), lambda n, j: (n, 0, j)),
        compiler_params=pltpu.CompilerParams(
            dimension_semantics=("parallel", "parallel"),
            vmem_limit_bytes=vmem_limit),
        cost_estimate=pl.CostEstimate(
            flops=2 * N * C * HW,
            transcendentals=0,
            bytes_accessed=N * C * HW * elt + N * HW * out_elt + C * 4 + 4),
    )(b, w, x)

    return out.reshape(N, 1, H, W)


def init_unet_head_params(key, in_channels):
    """Deterministic init matching the PyTorch module:
    - conv weight: kaiming_normal_ (fan_in = in_channels, gain=sqrt(2))
    - conv bias:   PyTorch Conv2d default uniform(-1/sqrt(fan_in), 1/sqrt(fan_in))
    """
    kw, kb = jax.random.split(key)
    fan_in = in_channels * 1 * 1
    std = (2.0 / fan_in) ** 0.5
    weight = std * jax.random.normal(kw, (1, in_channels, 1, 1), dtype=jnp.float32)
    bound = 1.0 / (fan_in ** 0.5)
    bias = jax.random.uniform(kb, (1,), minval=-bound, maxval=bound,
                              dtype=jnp.float32)
    return weight, bias


if __name__ == "__main__":
    key = jax.random.PRNGKey(0)
    k_x, k_p = jax.random.split(key)

    N, C, H, W = 2, 4, 16, 16
    feature = jax.random.normal(k_x, (N, C, H, W), dtype=jnp.float32)
    weight, bias = init_unet_head_params(k_p, C)

    out = jax.block_until_ready(unet_head_forward(feature, weight, bias))

    # Reference check (pure JAX 1x1 conv semantics).
    ref = jnp.einsum("nchw,oc->nohw", feature, weight.reshape(1, C)) + bias.reshape(
        1, 1, 1, 1)
    assert out.shape == (N, 1, H, W), out.shape
    assert jnp.allclose(out, ref, atol=1e-5, rtol=1e-5), float(
        jnp.max(jnp.abs(out - ref)))

    print("KERNEL_OK")
</pallas_src>

<mosaic_0001>
module attributes {stable_mosaic.version = 11 : i64} {
  func.func @kernel(%arg0: i32, %arg1: i32, %arg2: memref<1xf32, #tpu.memory_space<smem>>, %arg3: memref<4x1xf32, #tpu.memory_space<vmem>>, %arg4: memref<1x4x256xf32, #tpu.memory_space<vmem>>, %arg5: memref<1x1x256xf32, #tpu.memory_space<vmem>>) attributes {dimension_semantics = [#tpu.dimension_semantics<parallel>, #tpu.dimension_semantics<parallel>], iteration_bounds = array<i64: 2, 1>, scalar_prefetch = 0 : i64, scratch_operands = 0 : i64, tpu.core_type = #tpu.core_type<tc>, window_params = [{transform_indices = @transform_0, window_bounds = array<i64: 1>}, {pipeline_mode = #tpu.pipeline_mode<synchronous>, transform_indices = @transform_1, window_bounds = array<i64: 4, 1>}, {transform_indices = @transform_2, window_bounds = array<i64: 1, 4, 256>}, {transform_indices = @transform_3, window_bounds = array<i64: 1, 1, 256>}]} {
    %c0 = arith.constant 0 : index
    %c0_0 = arith.constant 0 : index
    %0 = vector.load %arg3[%c0, %c0_0] : memref<4x1xf32, #tpu.memory_space<vmem>>, vector<4x1xf32>
    %c0_1 = arith.constant 0 : index
    %1 = memref.load %arg2[%c0_1] : memref<1xf32, #tpu.memory_space<smem>>
    %c0_2 = arith.constant 0 : index
    %c0_3 = arith.constant 0 : index
    %c0_4 = arith.constant 0 : index
    %2 = vector.load %arg4[%c0_2, %c0_3, %c0_4] : memref<1x4x256xf32, #tpu.memory_space<vmem>>, vector<1x4x256xf32>
    %3 = vector.shape_cast %2 : vector<1x4x256xf32> to vector<4x256xf32>
    %4 = vector.broadcast %0 : vector<4x1xf32> to vector<4x256xf32>
    %5 = arith.mulf %3, %4 : vector<4x256xf32>
    %cst = arith.constant dense<0.000000e+00> : vector<256xf32>
    %6 = vector.multi_reduction <add>, %5, %cst [0] : vector<4x256xf32> to vector<256xf32>
    %7 = vector.shape_cast %6 : vector<256xf32> to vector<1x256xf32>
    %8 = vector.broadcast %1 : f32 to vector<1x256xf32>
    %9 = arith.addf %7, %8 : vector<1x256xf32>
    %c0_5 = arith.constant 0 : index
    %c0_6 = arith.constant 0 : index
    %c0_7 = arith.constant 0 : index
    %10 = vector.load %arg5[%c0_5, %c0_6, %c0_7] : memref<1x1x256xf32, #tpu.memory_space<vmem>>, vector<1x1x256xf32>
    %11 = vector.shape_cast %10 : vector<1x1x256xf32> to vector<1x256xf32>
    %12 = vector.shape_cast %9 : vector<1x256xf32> to vector<1x1x256xf32>
    tpu.vector_store %arg5[%c0_5, %c0_6, %c0_7], %12 {strides = array<i32>} : memref<1x1x256xf32, #tpu.memory_space<vmem>>, vector<1x1x256xf32>,
    return
  }
  func.func @transform_0(%arg0: i32, %arg1: i32) -> i32 {
    %c0_i32 = arith.constant 0 : i32
    %c0_i32_0 = arith.constant 0 : i32
    return %c0_i32 : i32
  }
  func.func @transform_1(%arg0: i32, %arg1: i32) -> (i32, i32) {
    %c0_i32 = arith.constant 0 : i32
    %c0_i32_0 = arith.constant 0 : i32
    %c0_i32_1 = arith.constant 0 : i32
    return %c0_i32, %c0_i32_0 : i32, i32
  }
  func.func @transform_2(%arg0: i32, %arg1: i32) -> (i32, i32, i32) {
    %c0_i32 = arith.constant 0 : i32
    %c0_i32_0 = arith.constant 0 : i32
    return %arg0, %c0_i32, %arg1 : i32, i32, i32
  }
  func.func @transform_3(%arg0: i32, %arg1: i32) -> (i32, i32, i32) {
    %c0_i32 = arith.constant 0 : i32
    %c0_i32_0 = arith.constant 0 : i32
    return %arg0, %c0_i32, %arg1 : i32, i32, i32
  }
}

</mosaic_0001>

<bundles_post_ra>
// kernel: tpu_custom_call.1
= control target key start
LH: loop header
LB: loop body
LE: loop exit
PB: predicated region body
PF: predicated region fallthrough
CT: control target
= control target key end

     0   :  { %s770_s0 = inlined_call_operand.<no memory space> [shape: f32[1], index: 0, kind: input, shape index: {}]   ;;  %s771_s1 = inlined_call_operand.vmem [shape: f32[4,1], index: 1, kind: input, shape index: {}]   ;;  %s772_s2 = inlined_call_operand.hbm [shape: f32[2,4,256], index: 2, kind: input, shape index: {}]   ;;  %s773_s3 = inlined_call_operand.hbm [shape: f32[2,1,256], index: 3, kind: output, shape index: {}]  }
   0x1   :  { %8 = sst [smem:[#allocation2]] %s770_s0 }
   0x2   :  { %9 = vsyncpa [#allocation4], 0 }
   0x3   :  { %11 = vsyncpa [#allocation4 + $0x1], 0 }
   0x4   :  { %12 = vsyncpa [#allocation5], 0 }
   0x5   :  { %14 = vsyncpa [#allocation5 + $0x1], 0  ;;  %s594_s14 = smov 0   ;;  %s596_s15 = smov 0  }
   0x6   :  { %s598_s16 = smov 0   ;;  %s600_s17 = smov 0  }
   0x7   :  { %s602_s18 = smov 0   ;;  %s604_s19 = smov 0  }
   0x8 LB: > { %s369_s0 = sadd.s32 4294967295, %s564_s19   ;;  %s370_s20 = sadd.s32 4294967294, %s564_s19   ;;  %s564_s19 = sphi %s604_s19, %s20_s19   ;;  %s560_s18 = sphi %s602_s18, %s789_s18   ;;  %s556_s17 = sphi %s600_s17, %s788_s17   ;;  %s552_s16 = sphi %s598_s16, %s787_s16   ;;  %s548_s15 = sphi %s596_s15, %s786_s15   ;;  %s544_s14 = sphi %s594_s14, %s785_s14  }
   0x9   : > { %s32_s21 = sadd.s32 1, %s560_s18  ;;  %s83_s22 = sadd.s32 1, %s552_s16 }
   0xa   : > { %p34_p0 = scmp.ge.s32.totalorder %s32_s21, 2  ;;  %p90_p1 = scmp.ne.s32.totalorder %s552_s16, %s548_s15 }
   0xb   : > { %p91_p2 = scmp.eq.s32.totalorder %s564_s19, 0  ;;  %p96_p3 = scmp.ne.s32.totalorder %s548_s15, %s544_s14 }
   0xc   : > { %s791_s21 = smov (%p34_p0, %s32_s21), 0  ;;  %p97_p5 = scmp.eq.s32.totalorder %s369_s0, 0 }
   0xd   : > { %p635_p4 = por %p91_p2, %p90_p1  ;;  %s78_s24 = ssub.s32 %s560_s18, %s791_s21 }
   0xe   : > { %p122_p6 = scmp.eq.s32.totalorder %s369_s0, 1  ;;  %p81_p7 = scmp.eq.s32.totalorder %s78_s24, 0 }
   0xf   : > { %p641_p8 = por %p97_p5, %p96_p3  ;;  %p128_p10 = scmp.eq.s32.totalorder %s370_s20, 1 }
  0x10   : > { %p645_p9 = por %p122_p6, %p90_p1  ;;  %p398_p13 = scmp.lt.s32.totalorder %s564_s19, 2 }
  0x11   : > { %s650_s27 = scalar_select %p81_p7, %s552_s16, %s83_s22  }
  0x12   : > { %s777_s26 = scalar_select %p645_p9, 1, 0 }
  0x13   : > { %p652_p11 = por %p128_p10, %p96_p3  ;;  %s154_s29 = sand.u32 1, %s552_s16  }
  0x14   : > { %s373_s30 = sshll.u32 %s154_s29, 3  ;;  %s384_s4 = sshll.u32 %s560_s18, 7 }
  0x15   : > { %s778_s28 = scalar_select %p652_p11, 1, 0 }
  0x16   : > { %s663_s7 = scalar_lea.hbm %s772_s2, %s384_s4  ;;  %s158_s8 = scalar_lea.vmem [#allocation3], %s373_s30 }
  0x17   : > { %s168_s9 = sshll.u32 %s158_s8, 4  ;;  %p669_p0 = pnand %p398_p13, %p635_p4  ;;  %s665_s9 = int_to_ptr.vmem [resolvable:$true] %s168_s9 }
  0x18   : > { %s155_s11 = scalar_lea.sflag [#allocation4], %s154_s29  ;;  %s452_s12 = scalar_lea.hbm %s663_s7, 128 }
  0x19   : > { %p453_p3 = scmp.ne.s32.totalorder %s663_s7, %s452_s12  ;;  %p454_p5 = pneg %p669_p0 }
  0x1a   : > { %s457_s20 = scalar_lea.hbm %s772_s2, 256  ;;  %p458_p4 = scmp.lt.u32.totalorder %s663_s7, %s772_s2 }
  0x1b   : > { %p455_p6 = pnand %p454_p5, %p453_p3  ;;  %p459_p10 = scmp.lt.u32.totalorder %s457_s20, %s452_s12 }
  0x1c   : > { %p461_p12 = scmp.lt.u32.totalorder %s452_s12, %s663_s7 }
  0x1d   : > { %p456_p7 = pneg %p455_p6  ;;  %p460_p13 = por %p459_p10, %p458_p4 }
  0x1f   : > { %p462_p1 = por %p461_p12, %p460_p13 }
  0x21   : > { %p463_p2 = pnand %p462_p1, %p456_p7 }
  0x23   : > { %466 = shalt.err (!%p463_p2)
}
  0x24   : > { %s467_s24 = scalar_lea.vmem %s665_s9, 128  ;;  %s566_s29 = smov [#allocation3]  }
  0x25   : > { %p468_p3 = scmp.ne.s32.totalorder %s665_s9, %s467_s24  ;;  %s472_s30 = sshll.u32 %s566_s29, 4  ;;  %s473_s30 = int_to_ptr.vmem [resolvable:$false] %s472_s30 }
  0x26   : > { %s474_s4 = scalar_lea.vmem %s473_s30, 256  ;;  %p475_p9 = scmp.lt.s32.totalorder %s665_s9, %s473_s30 }
  0x27   : > { %p470_p6 = pnand %p468_p3, %p454_p5  ;;  %p476_p4 = scmp.lt.s32.totalorder %s474_s4, %s467_s24 }
  0x29   : > { %p471_p11 = pneg %p470_p6  ;;  %p477_p10 = por %p476_p4, %p475_p9 }
  0x2b   : > { %p478_p12 = pnand %p477_p10, %p471_p11 }
  0x2d   : > { %481 = shalt.err (!%p478_p12)
}
  0x2e   : > { %393 = dma.hbm_to_vmem [thread:$0]  (!%p669_p0), %s663_s7, 128, %s665_s9, %s155_s11  }
  0x2f   : > { %p780_p1 = scmp.lt.s32.totalorder %s564_s19, 3  ;;  %p781_p2 = scmp.ge.s32.totalorder %s564_s19, 1 }
  0x31   : > { %p174_p5 = pnand %p781_p2, %p780_p1 }
  0x32   : > { %s705_s5 = sand.u32 (!%p174_p5), 1, %s548_s15  }
  0x33   : > { %177 = sbr.rel (%p174_p5) target bundleno = 230 (0xe6), region = 32  ;;  %s377_s6 = sshll.u32 (!%p174_p5), %s705_s5, 3 }
  0x34   : > { %s180_s8 = scalar_lea.sflag (!%p174_p5), [#allocation4], %s705_s5  ;;  %s183_s12 = scalar_lea.vmem (!%p174_p5), [#allocation3], %s377_s6 }
  0x3a   : > { %535 = dma.done.wait (%p641_p8), %s180_s8, 128  }
  0x3b   : > { %537 = vsyncadd (%p641_p8), %s180_s8, 4294967168  ;;  %v567_v0 = vmov 0   ;;  %v208_v1 = vld [vmem:[%s771_s1] sm:$0xf]  ;;  %v568_v2 = vmov 839922192   ;;  %v218_v4 = vlaneseq }
  0x3c   : > { %451 = vset.pattern.permute.xlu0 %v567_v0  ;;  %v216_v3 = vunpack.c.l.s4 %v568_v2  ;;  %v210_v8 = vld [vmem:[%s183_s12] sm:$0xff]  ;;  %vm227_vm0 = vcmask 1043456   ;;  %s209_s25 = sld [smem:[#allocation2]]  ;;  %v569_v20 = vmov 1966171168   ;;  %s378_s10 = sshll.u32 %s705_s5, 1 }
  0x3d   : > { %213 = vperm.xlu0 %451, %v208_v1   ;;  %v219_v6 = vshrl.u32 %v218_v4, 7  ;;  %v249_v21 = vunpack.c.l.s4 %v569_v20  ;;  %s385_s11 = sshll.u32 %s556_s17, 5  ;;  %s205_s13 = scalar_lea.vmem [#allocation6], %s378_s10  ;;  %vm265_vm1 = vcmp.lt.s32.totalorder %v218_v4, 256 }
  0x3e   : > { %v217_v5 = vunpack.c.0.s8 %v216_v3  ;;  %s285_s0 = sshll.u32 %s205_s13, 4  ;;  %s721_s23 = scalar_lea.hbm %s773_s3, %s385_s11  ;;  %s723_s0 = int_to_ptr.vmem [resolvable:$true] %s285_s0 }
  0x3f   : > { %v250_v26 = vunpack.c.0.s8 %v249_v21  ;;  %s269_s24 = scalar_lea.sflag [#allocation5], %s705_s5  ;;  %s482_s29 = scalar_lea.vmem %s723_s0, 32 }
  0x40   : > { %v220_v7 = vsub.s32 %v217_v5, %v219_v6  ;;  %p483_p8 = scmp.ne.s32.totalorder %s723_s0, %s482_s29  ;;  %p782_p9 = scmp.ne.s32.totalorder %s777_s26, 0 }
  0x41   : > { %v253_v31 = vsub.s32 %v250_v26, %v219_v6  ;;  %s570_s17 = smov [#allocation6]  }
  0x42   : > { %v242_v29 = vstv %s209_s25  ;;  %p484_p11 = pnand %p483_p8, %p782_p9  ;;  %s486_s30 = sshll.u32 %s570_s17, 4  ;;  %s487_s30 = int_to_ptr.vmem [resolvable:$false] %s486_s30 }
  0x43   : > { %s488_s4 = scalar_lea.vmem %s487_s30, 64  ;;  %p489_p7 = scmp.lt.s32.totalorder %s723_s0, %s487_s30 }
  0x44   : > { %p485_p0 = pneg %p484_p11  ;;  %p490_p13 = scmp.lt.s32.totalorder %s488_s4, %s482_s29 }
  0x46   : > { %p491_p3 = por %p490_p13, %p489_p7 }
  0x48   : > { %p492_p6 = pnand %p491_p3, %p485_p0 }
  0xbc   : > { %v214_v9 = vpop.permute.xlu0 %213 }
  0xbd   : > { %v221_v10 = vrot.slane %v214_v9, %v220_v7 }
  0xbf   : > { %v223_v11 = vmul.f32 %v221_v10, %v210_v8 }
  0xc1   : > { %v225_v12 = vcombine.high %v223_v11, %v223_v11  ;;  %v228_v13 = vsel %vm227_vm0, %v223_v11, 0.0 }
  0xc2   : > { %v229_v14 = vrot.slane %v228_v13, 4 }
  0xc3   : > { %v235_v15 = vsel %vm227_vm0, %v225_v12, 0.0 }
  0xc4   : > { %v230_v16 = vadd.f32 %v229_v14, %v228_v13  ;;  %v236_v17 = vrot.slane %v235_v15, 4 }
  0xc6   : > { %v231_v18 = vrot.slane %v230_v16, 2  ;;  %v237_v19 = vadd.f32 %v236_v17, %v235_v15 }
  0xc8   : > { %v232_v22 = vadd.f32 %v231_v18, %v230_v16  ;;  %v238_v23 = vrot.slane %v237_v19, 2 }
  0xca   : > { %v233_v24 = vrot.slane %v232_v22, 1  ;;  %v239_v25 = vadd.f32 %v238_v23, %v237_v19 }
  0xcc   : > { %v234_v27 = vadd.f32 %v233_v24, %v232_v22  ;;  %v240_v28 = vrot.slane %v239_v25, 1 }
  0xce   : > { %v241_v30 = vadd.f32 %v240_v28, %v239_v25  ;;  %v243_v32 = vadd.f32 %v242_v29, %v234_v27 }
  0xd0   : > { %v244_v33 = vadd.f32 %v242_v29, %v241_v30 }
  0xd2   : > { %v247_v34 = vcombine.low %v243_v32, %v244_v33 }
  0xd4   : > { %v254_v35 = vrot.slane %v247_v34, %v253_v31 }
  0xd6   : > { %v261_v36 = vrot.slane %v254_v35, %v253_v31 }
  0xd8   : > { %267 = vst.msk [vmem:[%s205_s13] sm:$0x3] %vm265_vm1, %v261_v36 }
  0xd9   : > { %495 = shalt.err (!%p492_p6)
}
  0xda   : > { %s496_s5 = scalar_lea.hbm %s721_s23, 32  ;;  %s500_s12 = scalar_lea.hbm %s773_s3, 64 }
  0xdb   : > { %p497_p4 = scmp.ne.s32.totalorder %s721_s23, %s496_s5  ;;  %p501_p1 = scmp.lt.u32.totalorder %s721_s23, %s773_s3 }
  0xdc   : > { %p502_p2 = scmp.lt.u32.totalorder %s500_s12, %s496_s5  ;;  %p504_p8 = scmp.lt.u32.totalorder %s496_s5, %s721_s23 }
  0xdd   : > { %p498_p10 = pnand %p497_p4, %p782_p9 }
  0xde   : > { %p503_p5 = por %p502_p2, %p501_p1 }
  0xdf   : > { %p499_p12 = pneg %p498_p10 }
  0xe0   : > { %p505_p11 = por %p504_p8, %p503_p5 }
  0xe2   : > { %p506_p0 = pnand %p505_p11, %p499_p12 }
  0xe4   : > { %509 = shalt.err (!%p506_p0)
}
  0xe5   : > { %388 = dma.vmem_to_hbm [thread:$0]  (%p782_p9), %s723_s0, 32, %s721_s23, %s269_s24  }
  0xe6 PF: > { %s297_s25 = sand.u32 1, %s544_s14   ;;  %p783_p7 = scmp.ne.s32.totalorder %s778_s28, 0 }
  0xe7   : > { %p784_p13 = scmp.ge.s32.totalorder %s564_s19, 2  ;;  %s298_s10 = scalar_lea.sflag [#allocation5], %s297_s25 }
  0xe9   : > { %p395_p3 = pnand %p784_p13, %p783_p7 }
  0xeb   : > { %539 = dma.done.wait (!%p395_p3), %s298_s10, 32  }
  0xec   : > { %541 = vsyncadd (!%p395_p3), %s298_s10, 4294967264  ;;  %s20_s19 = sadd.s32 1, %s564_s19   ;;  %s785_s14 = smov %s548_s15 }
  0xed   : > { %p17_p6 = scmp.ge.s32.totalorder %s20_s19, 4   ;;  %s786_s15 = smov %s552_s16 }
  0xee   : > { %s787_s16 = smov %s650_s27  ;;  %s788_s17 = smov %s560_s18 }
  0xef   : > { %s789_s18 = smov %s791_s21  ;;  %19 = sbr.rel (!%p17_p6) target bundleno = 8 (0x8), region = 77 }
  0xf6   :  { %303 = vsyncpa [#allocation4], 1 }
  0xf7   :  { %305 = vsyncpa [#allocation4 + $0x1], 1 }
  0xf8   :  { %306 = vsyncpa [#allocation5], 1 }
  0xf9   :  { %308 = vsyncpa [#allocation5 + $0x1], 1 }

</bundles_post_ra>
